<compile_context>
chip_gen: v7x
topology: tpu7x:2x2x1
jax: 0.10.0
libtpu: 0.0.40
codegen_flags: <defaults>
</compile_context>

<pallas_src>
import functools

import jax
import jax.numpy as jnp
from jax.experimental import pallas as pl
from jax.experimental.pallas import tpu as pltpu

HIDDEN = 64
BN_EPS = 1e-4


def _round_up(x, m):
    return (x + m - 1) // m * m


# --------------- Pass 1: fc1 + per-tile BN partial stats (stats-only) ---------------
def _fc1_stats_kernel(x_ref, w1_ref, b1_ref, stats_ref, *, true_b, tile_b, mxu_dtype):
    # fc1 on the MXU, f32 accumulation; cast to MXU dtype in-kernel (VPU slack).
    h = jnp.dot(x_ref[...].astype(mxu_dtype), w1_ref[...].astype(mxu_dtype),
                preferred_element_type=jnp.float32)
    h = h + b1_ref[...]

    # Mask rows past the true batch (ragged last tile reads undefined data).
    i = pl.program_id(0)
    row = i * tile_b + jax.lax.broadcasted_iota(jnp.int32, (tile_b, 1), 0)
    valid = row < true_b
    count = jnp.minimum(true_b - i * tile_b, tile_b).astype(jnp.float32)

    hm = jnp.where(valid, h, 0.0)
    s = jnp.sum(hm, axis=0, keepdims=True)                       # (1, 64)
    tile_mean = s / count
    centered = jnp.where(valid, h - tile_mean, 0.0)
    m2 = jnp.sum(centered * centered, axis=0, keepdims=True)     # (1, 64)

    packed = jnp.concatenate([s, m2], axis=-1)                   # (1, 128) lane-dense
    rowid = jax.lax.broadcasted_iota(jnp.int32, (8, 2 * HIDDEN), 0)
    stats_ref[...] = jnp.where(rowid == 0, packed, 0.0)          # row 0 data, 1-7 zero


# -------- Pass 2: recompute fc1, BN normalize + ReLU + fused fc2|fc3 + sample --------
def _bn_head_kernel(x_ref, noise_ref, w1_ref, b1_ref, mean_ref, inv_std_ref,
                    w23_ref, b23_ref, sample_ref, mu_ref, logvar_ref, *, mxu_dtype):
    # Recompute fc1 from x: 4*in_dim B/row of re-read vs 512 B/row for an f32 h
    # round-trip (a clear win for small/moderate in_dim).
    h = jnp.dot(x_ref[...].astype(mxu_dtype), w1_ref[...].astype(mxu_dtype),
                preferred_element_type=jnp.float32)
    h = h + b1_ref[...]

    hn = (h - mean_ref[...]) * inv_std_ref[...]
    hn = jnp.maximum(hn, 0.0)

    # Fused fc2|fc3 -> (tile_b, 128) = [mu | logvar]
    ml = jnp.dot(hn.astype(mxu_dtype), w23_ref[...].astype(mxu_dtype),
                 preferred_element_type=jnp.float32)
    ml = ml + b23_ref[...]

    mu = ml[:, :HIDDEN]
    logvar = ml[:, HIDDEN:]
    sample = noise_ref[...].astype(jnp.float32) * jnp.exp(0.5 * logvar) + mu

    sample_ref[...] = sample
    mu_ref[...] = mu
    logvar_ref[...] = logvar


# ------------------------------------- Wrapper ---------------------------------------
@functools.partial(jax.jit,
                   static_argnames=("tile_b", "mxu_dtype", "vmem_limit_bytes"))
def encoder_dy_forward(x, params, noise, *, tile_b=2048, mxu_dtype=jnp.bfloat16,
                       vmem_limit_bytes=48 * 1024 * 1024):
    """x: (B, in_dim) f32, noise: (B, 64) any float dtype.
    Returns (sample, mu, logvar), all (B, 64) f32."""
    B, in_dim = x.shape
    f32 = jnp.float32

    # Tile: multiple of 8 sublanes, capped at the (rounded-up) batch.
    tb = max(8, min(_round_up(tile_b, 8), _round_up(B, 8)))
    n_tiles = pl.cdiv(B, tb)

    w1 = params["w1"]
    b1 = params["b1"].astype(f32)
    w23 = jnp.concatenate([params["w2"], params["w3"]], axis=1)
    b23 = jnp.concatenate([params["b2"], params["b3"]], axis=1).astype(f32)

    cparams = pltpu.CompilerParams(
        dimension_semantics=("parallel",),
        vmem_limit_bytes=vmem_limit_bytes,
    )
    x_bytes = x.dtype.itemsize
    n_bytes = noise.dtype.itemsize
    w_bytes = w1.dtype.itemsize

    # ---- Pass 1: fc1 + per-tile (sum, centered-M2) partial statistics ----
    stats = pl.pallas_call(
        functools.partial(_fc1_stats_kernel, true_b=B, tile_b=tb,
                          mxu_dtype=mxu_dtype),
        out_shape=jax.ShapeDtypeStruct((n_tiles * 8, 2 * HIDDEN), f32),
        grid=(n_tiles,),
        in_specs=[
            pl.BlockSpec((tb, in_dim), lambda i: (i, 0)),        # x tile (streamed)
            pl.BlockSpec((in_dim, HIDDEN), lambda i: (0, 0)),    # w1 (resident)
            pl.BlockSpec((1, HIDDEN), lambda i: (0, 0)),         # b1 (resident)
        ],
        out_specs=pl.BlockSpec((8, 2 * HIDDEN), lambda i: (i, 0)),
        compiler_params=cparams,
        cost_estimate=pl.CostEstimate(
            flops=2 * B * in_dim * HIDDEN,
            transcendentals=0,
            bytes_accessed=(B * in_dim * x_bytes + in_dim * HIDDEN * w_bytes
                            + HIDDEN * 4 + n_tiles * 8 * 2 * HIDDEN * 4)),
    )(x, w1, b1)

    # ---- Tiny global merge (Chan et al. parallel variance; cancellation-safe) ----
    per_tile = jnp.sum(stats.reshape(n_tiles, 8, 2 * HIDDEN), axis=1)  # (n_tiles,128)
    tile_sum = per_tile[:, :HIDDEN]
    tile_m2 = per_tile[:, HIDDEN:]
    counts = jnp.asarray([min(tb, B - j * tb) for j in range(n_tiles)],
                         dtype=f32)[:, None]
    tile_mean = tile_sum / counts
    mean = jnp.sum(tile_sum, axis=0, keepdims=True) / B                 # (1, 64)
    m2 = (jnp.sum(tile_m2, axis=0, keepdims=True)
          + jnp.sum(counts * (tile_mean - mean) ** 2, axis=0, keepdims=True))
    var = m2 / B                                                        # biased var
    inv_std = jax.lax.rsqrt(var + BN_EPS)

    # ---- Pass 2: recompute fc1, BN + ReLU + fused fc2|fc3 + reparameterize ----
    sample, mu, logvar = pl.pallas_call(
        functools.partial(_bn_head_kernel, mxu_dtype=mxu_dtype),
        out_shape=(
            jax.ShapeDtypeStruct((B, HIDDEN), f32),   # sample
            jax.ShapeDtypeStruct((B, HIDDEN), f32),   # mu
            jax.ShapeDtypeStruct((B, HIDDEN), f32),   # logvar
        ),
        grid=(n_tiles,),
        in_specs=[
            pl.BlockSpec((tb, in_dim), lambda i: (i, 0)),            # x tile
            pl.BlockSpec((tb, HIDDEN), lambda i: (i, 0)),            # noise tile
            pl.BlockSpec((in_dim, HIDDEN), lambda i: (0, 0)),        # w1 (resident)
            pl.BlockSpec((1, HIDDEN), lambda i: (0, 0)),             # b1
            pl.BlockSpec((1, HIDDEN), lambda i: (0, 0)),             # mean
            pl.BlockSpec((1, HIDDEN), lambda i: (0, 0)),             # inv_std
            pl.BlockSpec((HIDDEN, 2 * HIDDEN), lambda i: (0, 0)),    # fused w2|w3
            pl.BlockSpec((1, 2 * HIDDEN), lambda i: (0, 0)),         # fused b2|b3
        ],
        out_specs=(
            pl.BlockSpec((tb, HIDDEN), lambda i: (i, 0)),
            pl.BlockSpec((tb, HIDDEN), lambda i: (i, 0)),
            pl.BlockSpec((tb, HIDDEN), lambda i: (i, 0)),
        ),
        compiler_params=cparams,
        cost_estimate=pl.CostEstimate(
            flops=(2 * B * in_dim * HIDDEN + 2 * B * HIDDEN * 2 * HIDDEN
                   + 10 * B * HIDDEN),
            transcendentals=B * HIDDEN,
            bytes_accessed=(B * in_dim * x_bytes + B * HIDDEN * n_bytes
                            + in_dim * HIDDEN * w_bytes
                            + HIDDEN * 2 * HIDDEN * w_bytes
                            + 4 * HIDDEN * 4 + 3 * B * HIDDEN * 4)),
    )(x, noise, w1, b1, mean, inv_std, w23, b23)

    return sample, mu, logvar


# ------------------------------------ Utilities --------------------------------------
def init_params(key, in_dim):
    """Deterministic init mimicking nn.Linear defaults (uniform +/- 1/sqrt(fan_in)).
    Weights stored pre-transposed as (in, out); biases as (1, out)."""
    k = jax.random.split(key, 6)

    def lin(kw, kb, fan_in, fan_out):
        bound = 1.0 / jnp.sqrt(jnp.float32(fan_in))
        w = jax.random.uniform(kw, (fan_in, fan_out), jnp.float32, -bound, bound)
        b = jax.random.uniform(kb, (1, fan_out), jnp.float32, -bound, bound)
        return w, b

    w1, b1 = lin(k[0], k[1], in_dim, HIDDEN)
    w2, b2 = lin(k[2], k[3], HIDDEN, HIDDEN)
    w3, b3 = lin(k[4], k[5], HIDDEN, HIDDEN)
    return {"w1": w1, "b1": b1, "w2": w2, "b2": b2, "w3": w3, "b3": b3}


def reference_forward(x, params, noise):
    """Pure-JAX f32 reference for correctness checking."""
    h = x @ params["w1"] + params["b1"]
    mean = jnp.mean(h, axis=0, keepdims=True)
    var = jnp.mean((h - mean) ** 2, axis=0, keepdims=True)
    h = (h - mean) / jnp.sqrt(var + BN_EPS)
    h = jnp.maximum(h, 0.0)
    mu = h @ params["w2"] + params["b2"]
    logvar = h @ params["w3"] + params["b3"]
    out = noise.astype(jnp.float32) * jnp.exp(0.5 * logvar) + mu
    return out, mu, logvar


if __name__ == "__main__":
    key = jax.random.PRNGKey(0)
    k_param, k_x, k_noise = jax.random.split(key, 3)

    # B=13 with tile_b=8 exercises multi-tile stats merge + ragged-last-tile masking.
    B, IN_DIM = 13, 32
    params = init_params(k_param, IN_DIM)
    x = jax.random.normal(k_x, (B, IN_DIM), dtype=jnp.float32)
    # TODO(synk): torch.randn_like noise is replaced by a jax.random Gaussian
    # passed in (bf16 to halve its HBM stream); reparam math stays f32 in-kernel.
    noise = jax.random.normal(k_noise, (B, HIDDEN), dtype=jnp.bfloat16)

    ref_out, ref_mu, ref_logvar = reference_forward(x, params, noise)

    # f32 MXU path, small tiles (multi-tile): tight tolerance.
    out, mu, logvar = encoder_dy_forward(x, params, noise,
                                         tile_b=8, mxu_dtype=jnp.float32)
    jax.block_until_ready((out, mu, logvar))
    assert out.shape == (B, HIDDEN) and mu.shape == (B, HIDDEN) and logvar.shape == (B, HIDDEN)
    assert jnp.allclose(mu, ref_mu, atol=1e-4, rtol=1e-4)
    assert jnp.allclose(logvar, ref_logvar, atol=1e-4, rtol=1e-4)
    assert jnp.allclose(out, ref_out, atol=1e-4, rtol=1e-4)

    # bf16 MXU path, default (large) tile: single oversized tile, looser tolerance.
    out_bf, mu_bf, logvar_bf = encoder_dy_forward(x, params, noise)
    jax.block_until_ready((out_bf, mu_bf, logvar_bf))
    assert jnp.allclose(mu_bf, ref_mu, atol=5e-2, rtol=5e-2)
    assert jnp.allclose(logvar_bf, ref_logvar, atol=5e-2, rtol=5e-2)
    assert jnp.allclose(out_bf, ref_out, atol=1e-1, rtol=1e-1)

    print("KERNEL_OK")
</pallas_src>

<mosaic_0001>
module attributes {stable_mosaic.version = 11 : i64} {
  func.func @_fc1_stats_kernel(%arg0: i32, %arg1: memref<8x32xf32, #tpu.memory_space<vmem>>, %arg2: memref<32x64xf32, #tpu.memory_space<vmem>>, %arg3: memref<1x64xf32, #tpu.memory_space<vmem>>, %arg4: memref<8x128xf32, #tpu.memory_space<vmem>>) attributes {dimension_semantics = [#tpu.dimension_semantics<parallel>], iteration_bounds = array<i64: 2>, scalar_prefetch = 0 : i64, scratch_operands = 0 : i64, tpu.core_type = #tpu.core_type<tc>, window_params = [{transform_indices = @transform_0, window_bounds = array<i64: 8, 32>}, {pipeline_mode = #tpu.pipeline_mode<synchronous>, transform_indices = @transform_1, window_bounds = array<i64: 32, 64>}, {pipeline_mode = #tpu.pipeline_mode<synchronous>, transform_indices = @transform_2, window_bounds = array<i64: 1, 64>}, {transform_indices = @transform_3, window_bounds = array<i64: 8, 128>}]} {
    %c0 = arith.constant 0 : index
    %c0_0 = arith.constant 0 : index
    %0 = vector.load %arg1[%c0, %c0_0] : memref<8x32xf32, #tpu.memory_space<vmem>>, vector<8x32xf32>
    %c0_1 = arith.constant 0 : index
    %c0_2 = arith.constant 0 : index
    %1 = vector.load %arg2[%c0_1, %c0_2] : memref<32x64xf32, #tpu.memory_space<vmem>>, vector<32x64xf32>
    %cst = arith.constant dense<0.000000e+00> : vector<8x64xf32>
    %2 = tpu.matmul %0, %1, %cst {dimension_numbers = #tpu.dot_dimension_numbers<[1], [0], [0], [1], [0, 0, 1, 1], [], []>} : vector<8x32xf32>, vector<32x64xf32>, vector<8x64xf32> -> vector<8x64xf32>
    %c0_3 = arith.constant 0 : index
    %c0_4 = arith.constant 0 : index
    %3 = vector.load %arg3[%c0_3, %c0_4] : memref<1x64xf32, #tpu.memory_space<vmem>>, vector<1x64xf32>
    %4 = vector.broadcast %3 : vector<1x64xf32> to vector<8x64xf32>
    %5 = arith.addf %2, %4 : vector<8x64xf32>
    %c8_i32 = arith.constant 8 : i32
    %6 = arith.muli %arg0, %c8_i32 : i32
    %7 = tpu.iota {dimensions = array<i32: 0>} : vector<8x1xi32>
    %8 = vector.broadcast %6 : i32 to vector<8x1xi32>
    %9 = arith.addi %8, %7 : vector<8x1xi32>
    %c13_i32 = arith.constant 13 : i32
    %10 = vector.broadcast %c13_i32 : i32 to vector<8x1xi32>
    %11 = arith.cmpi slt, %9, %10 : vector<8x1xi32>
    %c8_i32_5 = arith.constant 8 : i32
    %12 = arith.muli %arg0, %c8_i32_5 : i32
    %c13_i32_6 = arith.constant 13 : i32
    %13 = arith.subi %c13_i32_6, %12 : i32
    %c8_i32_7 = arith.constant 8 : i32
    %14 = arith.minsi %13, %c8_i32_7 : i32
    %15 = arith.sitofp %14 : i32 to f32
    %cst_8 = arith.constant 0.000000e+00 : f32
    %16 = vector.shape_cast %11 : vector<8x1xi1> to vector<8x1xi1>
    %17 = vector.broadcast %16 : vector<8x1xi1> to vector<8x64xi1>
    %18 = vector.broadcast %cst_8 : f32 to vector<8x64xf32>
    %19 = arith.select %17, %5, %18 : vector<8x64xi1>, vector<8x64xf32>
    %cst_9 = arith.constant dense<0.000000e+00> : vector<64xf32>
    %20 = vector.multi_reduction <add>, %19, %cst_9 [0] : vector<8x64xf32> to vector<64xf32>
    %21 = vector.shape_cast %20 : vector<64xf32> to vector<1x64xf32>
    %22 = vector.broadcast %15 : f32 to vector<1x64xf32>
    %23 = arith.divf %21, %22 : vector<1x64xf32>
    %24 = vector.broadcast %23 : vector<1x64xf32> to vector<8x64xf32>
    %25 = arith.subf %5, %24 : vector<8x64xf32>
    %cst_10 = arith.constant 0.000000e+00 : f32
    %26 = vector.shape_cast %11 : vector<8x1xi1> to vector<8x1xi1>
    %27 = vector.broadcast %26 : vector<8x1xi1> to vector<8x64xi1>
    %28 = vector.broadcast %cst_10 : f32 to vector<8x64xf32>
    %29 = arith.select %27, %25, %28 : vector<8x64xi1>, vector<8x64xf32>
    %30 = arith.mulf %29, %29 : vector<8x64xf32>
    %cst_11 = arith.constant dense<0.000000e+00> : vector<64xf32>
    %31 = vector.multi_reduction <add>, %30, %cst_11 [0] : vector<8x64xf32> to vector<64xf32>
    %32 = vector.shape_cast %31 : vector<64xf32> to vector<1x64xf32>
    %33 = tpu.concatenate %21, %32 in 1 : vector<1x64xf32>, vector<1x64xf32> -> vector<1x128xf32>
    %34 = tpu.iota {dimensions = array<i32: 0>} : vector<8x128xi32>
    %c0_i32 = arith.constant 0 : i32
    %35 = vector.broadcast %c0_i32 : i32 to vector<8x128xi32>
    %36 = arith.cmpi eq, %34, %35 : vector<8x128xi32>
    %cst_12 = arith.constant 0.000000e+00 : f32
    %37 = vector.shape_cast %33 : vector<1x128xf32> to vector<1x128xf32>
    %38 = vector.broadcast %37 : vector<1x128xf32> to vector<8x128xf32>
    %39 = vector.broadcast %cst_12 : f32 to vector<8x128xf32>
    %40 = arith.select %36, %38, %39 : vector<8x128xi1>, vector<8x128xf32>
    %c0_13 = arith.constant 0 : index
    %c0_14 = arith.constant 0 : index
    %41 = vector.load %arg4[%c0_13, %c0_14] : memref<8x128xf32, #tpu.memory_space<vmem>>, vector<8x128xf32>
    tpu.vector_store %arg4[%c0_13, %c0_14], %40 {strides = array<i32>} : memref<8x128xf32, #tpu.memory_space<vmem>>, vector<8x128xf32>,
    return
  }
  func.func @transform_0(%arg0: i32) -> (i32, i32) {
    %c0_i32 = arith.constant 0 : i32
    %c0_i32_0 = arith.constant 0 : i32
    return %arg0, %c0_i32 : i32, i32
  }
  func.func @transform_1(%arg0: i32) -> (i32, i32) {
    %c0_i32 = arith.constant 0 : i32
    %c0_i32_0 = arith.constant 0 : i32
    %c0_i32_1 = arith.constant 0 : i32
    return %c0_i32, %c0_i32_0 : i32, i32
  }
  func.func @transform_2(%arg0: i32) -> (i32, i32) {
    %c0_i32 = arith.constant 0 : i32
    %c0_i32_0 = arith.constant 0 : i32
    %c0_i32_1 = arith.constant 0 : i32
    return %c0_i32, %c0_i32_0 : i32, i32
  }
  func.func @transform_3(%arg0: i32) -> (i32, i32) {
    %c0_i32 = arith.constant 0 : i32
    %c0_i32_0 = arith.constant 0 : i32
    return %arg0, %c0_i32 : i32, i32
  }
}

module attributes {stable_mosaic.version = 11 : i64} {
  func.func @_bn_head_kernel(%arg0: i32, %arg1: memref<8x32xf32, #tpu.memory_space<vmem>>, %arg2: memref<8x64xbf16, #tpu.memory_space<vmem>>, %arg3: memref<32x64xf32, #tpu.memory_space<vmem>>, %arg4: memref<1x64xf32, #tpu.memory_space<vmem>>, %arg5: memref<1x64xf32, #tpu.memory_space<vmem>>, %arg6: memref<1x64xf32, #tpu.memory_space<vmem>>, %arg7: memref<64x128xf32, #tpu.memory_space<vmem>>, %arg8: memref<1x128xf32, #tpu.memory_space<vmem>>, %arg9: memref<8x64xf32, #tpu.memory_space<vmem>>, %arg10: memref<8x64xf32, #tpu.memory_space<vmem>>, %arg11: memref<8x64xf32, #tpu.memory_space<vmem>>) attributes {dimension_semantics = [#tpu.dimension_semantics<parallel>], iteration_bounds = array<i64: 2>, scalar_prefetch = 0 : i64, scratch_operands = 0 : i64, tpu.core_type = #tpu.core_type<tc>, window_params = [{transform_indices = @transform_0, window_bounds = array<i64: 8, 32>}, {transform_indices = @transform_1, window_bounds = array<i64: 8, 64>}, {pipeline_mode = #tpu.pipeline_mode<synchronous>, transform_indices = @transform_2, window_bounds = array<i64: 32, 64>}, {pipeline_mode = #tpu.pipeline_mode<synchronous>, transform_indices = @transform_3, window_bounds = array<i64: 1, 64>}, {pipeline_mode = #tpu.pipeline_mode<synchronous>, transform_indices = @transform_4, window_bounds = array<i64: 1, 64>}, {pipeline_mode = #tpu.pipeline_mode<synchronous>, transform_indices = @transform_5, window_bounds = array<i64: 1, 64>}, {pipeline_mode = #tpu.pipeline_mode<synchronous>, transform_indices = @transform_6, window_bounds = array<i64: 64, 128>}, {pipeline_mode = #tpu.pipeline_mode<synchronous>, transform_indices = @transform_7, window_bounds = array<i64: 1, 128>}, {transform_indices = @transform_8, window_bounds = array<i64: 8, 64>}, {transform_indices = @transform_9, window_bounds = array<i64: 8, 64>}, {transform_indices = @transform_10, window_bounds = array<i64: 8, 64>}]} {
    %c0 = arith.constant 0 : index
    %c0_0 = arith.constant 0 : index
    %0 = vector.load %arg1[%c0, %c0_0] : memref<8x32xf32, #tpu.memory_space<vmem>>, vector<8x32xf32>
    %c0_1 = arith.constant 0 : index
    %c0_2 = arith.constant 0 : index
    %1 = vector.load %arg3[%c0_1, %c0_2] : memref<32x64xf32, #tpu.memory_space<vmem>>, vector<32x64xf32>
    %cst = arith.constant dense<0.000000e+00> : vector<8x64xf32>
    %2 = tpu.matmul %0, %1, %cst {dimension_numbers = #tpu.dot_dimension_numbers<[1], [0], [0], [1], [0, 0, 1, 1], [], []>} : vector<8x32xf32>, vector<32x64xf32>, vector<8x64xf32> -> vector<8x64xf32>
    %c0_3 = arith.constant 0 : index
    %c0_4 = arith.constant 0 : index
    %3 = vector.load %arg4[%c0_3, %c0_4] : memref<1x64xf32, #tpu.memory_space<vmem>>, vector<1x64xf32>
    %4 = vector.broadcast %3 : vector<1x64xf32> to vector<8x64xf32>
    %5 = arith.addf %2, %4 : vector<8x64xf32>
    %c0_5 = arith.constant 0 : index
    %c0_6 = arith.constant 0 : index
    %6 = vector.load %arg5[%c0_5, %c0_6] : memref<1x64xf32, #tpu.memory_space<vmem>>, vector<1x64xf32>
    %7 = vector.broadcast %6 : vector<1x64xf32> to vector<8x64xf32>
    %8 = arith.subf %5, %7 : vector<8x64xf32>
    %c0_7 = arith.constant 0 : index
    %c0_8 = arith.constant 0 : index
    %9 = vector.load %arg6[%c0_7, %c0_8] : memref<1x64xf32, #tpu.memory_space<vmem>>, vector<1x64xf32>
    %10 = vector.broadcast %9 : vector<1x64xf32> to vector<8x64xf32>
    %11 = arith.mulf %8, %10 : vector<8x64xf32>
    %cst_9 = arith.constant 0.000000e+00 : f32
    %12 = vector.broadcast %cst_9 : f32 to vector<8x64xf32>
    %13 = arith.maximumf %11, %12 : vector<8x64xf32>
    %c0_10 = arith.constant 0 : index
    %c0_11 = arith.constant 0 : index
    %14 = vector.load %arg7[%c0_10, %c0_11] : memref<64x128xf32, #tpu.memory_space<vmem>>, vector<64x128xf32>
    %cst_12 = arith.constant dense<0.000000e+00> : vector<8x128xf32>
    %15 = tpu.matmul %13, %14, %cst_12 {dimension_numbers = #tpu.dot_dimension_numbers<[1], [0], [0], [1], [0, 0, 1, 1], [], []>} : vector<8x64xf32>, vector<64x128xf32>, vector<8x128xf32> -> vector<8x128xf32>
    %c0_13 = arith.constant 0 : index
    %c0_14 = arith.constant 0 : index
    %16 = vector.load %arg8[%c0_13, %c0_14] : memref<1x128xf32, #tpu.memory_space<vmem>>, vector<1x128xf32>
    %17 = vector.broadcast %16 : vector<1x128xf32> to vector<8x128xf32>
    %18 = arith.addf %15, %17 : vector<8x128xf32>
    %19 = vector.extract_strided_slice %18 {offsets = [0, 0], sizes = [8, 64], strides = [1, 1]} : vector<8x128xf32> to vector<8x64xf32>
    %20 = vector.extract_strided_slice %18 {offsets = [0, 64], sizes = [8, 64], strides = [1, 1]} : vector<8x128xf32> to vector<8x64xf32>
    %c0_15 = arith.constant 0 : index
    %c0_16 = arith.constant 0 : index
    %21 = vector.load %arg2[%c0_15, %c0_16] : memref<8x64xbf16, #tpu.memory_space<vmem>>, vector<8x64xbf16>
    %22 = arith.extf %21 : vector<8x64xbf16> to vector<8x64xf32>
    %cst_17 = arith.constant 5.000000e-01 : f32
    %23 = vector.broadcast %cst_17 : f32 to vector<8x64xf32>
    %24 = arith.mulf %23, %20 : vector<8x64xf32>
    %25 = math.exp %24 : vector<8x64xf32>
    %26 = arith.mulf %22, %25 : vector<8x64xf32>
    %27 = arith.addf %26, %19 : vector<8x64xf32>
    %c0_18 = arith.constant 0 : index
    %c0_19 = arith.constant 0 : index
    %28 = vector.load %arg9[%c0_18, %c0_19] : memref<8x64xf32, #tpu.memory_space<vmem>>, vector<8x64xf32>
    tpu.vector_store %arg9[%c0_18, %c0_19], %27 {strides = array<i32>} : memref<8x64xf32, #tpu.memory_space<vmem>>, vector<8x64xf32>,
    %c0_20 = arith.constant 0 : index
    %c0_21 = arith.constant 0 : index
    %29 = vector.load %arg10[%c0_20, %c0_21] : memref<8x64xf32, #tpu.memory_space<vmem>>, vector<8x64xf32>
    tpu.vector_store %arg10[%c0_20, %c0_21], %19 {strides = array<i32>} : memref<8x64xf32, #tpu.memory_space<vmem>>, vector<8x64xf32>,
    %c0_22 = arith.constant 0 : index
    %c0_23 = arith.constant 0 : index
    %30 = vector.load %arg11[%c0_22, %c0_23] : memref<8x64xf32, #tpu.memory_space<vmem>>, vector<8x64xf32>
    tpu.vector_store %arg11[%c0_22, %c0_23], %20 {strides = array<i32>} : memref<8x64xf32, #tpu.memory_space<vmem>>, vector<8x64xf32>,
    return
  }
  func.func @transform_0(%arg0: i32) -> (i32, i32) {
    %c0_i32 = arith.constant 0 : i32
    %c0_i32_0 = arith.constant 0 : i32
    return %arg0, %c0_i32 : i32, i32
  }
  func.func @transform_1(%arg0: i32) -> (i32, i32) {
    %c0_i32 = arith.constant 0 : i32
    %c0_i32_0 = arith.constant 0 : i32
    return %arg0, %c0_i32 : i32, i32
  }
  func.func @transform_2(%arg0: i32) -> (i32, i32) {
    %c0_i32 = arith.constant 0 : i32
    %c0_i32_0 = arith.constant 0 : i32
    %c0_i32_1 = arith.constant 0 : i32
    return %c0_i32, %c0_i32_0 : i32, i32
  }
  func.func @transform_3(%arg0: i32) -> (i32, i32) {
    %c0_i32 = arith.constant 0 : i32
    %c0_i32_0 = arith.constant 0 : i32
    %c0_i32_1 = arith.constant 0 : i32
    return %c0_i32, %c0_i32_0 : i32, i32
  }
  func.func @transform_4(%arg0: i32) -> (i32, i32) {
    %c0_i32 = arith.constant 0 : i32
    %c0_i32_0 = arith.constant 0 : i32
    %c0_i32_1 = arith.constant 0 : i32
    return %c0_i32, %c0_i32_0 : i32, i32
  }
  func.func @transform_5(%arg0: i32) -> (i32, i32) {
    %c0_i32 = arith.constant 0 : i32
    %c0_i32_0 = arith.constant 0 : i32
    %c0_i32_1 = arith.constant 0 : i32
    return %c0_i32, %c0_i32_0 : i32, i32
  }
  func.func @transform_6(%arg0: i32) -> (i32, i32) {
    %c0_i32 = arith.constant 0 : i32
    %c0_i32_0 = arith.constant 0 : i32
    %c0_i32_1 = arith.constant 0 : i32
    return %c0_i32, %c0_i32_0 : i32, i32
  }
  func.func @transform_7(%arg0: i32) -> (i32, i32) {
    %c0_i32 = arith.constant 0 : i32
    %c0_i32_0 = arith.constant 0 : i32
    %c0_i32_1 = arith.constant 0 : i32
    return %c0_i32, %c0_i32_0 : i32, i32
  }
  func.func @transform_8(%arg0: i32) -> (i32, i32) {
    %c0_i32 = arith.constant 0 : i32
    %c0_i32_0 = arith.constant 0 : i32
    return %arg0, %c0_i32 : i32, i32
  }
  func.func @transform_9(%arg0: i32) -> (i32, i32) {
    %c0_i32 = arith.constant 0 : i32
    %c0_i32_0 = arith.constant 0 : i32
    return %arg0, %c0_i32 : i32, i32
  }
  func.func @transform_10(%arg0: i32) -> (i32, i32) {
    %c0_i32 = arith.constant 0 : i32
    %c0_i32_0 = arith.constant 0 : i32
    return %arg0, %c0_i32 : i32, i32
  }
}

</mosaic_0001>

<bundles_post_ra>
// kernel: encoder_dy_forward.2
= control target key start
LH: loop header
LB: loop body
LE: loop exit
PB: predicated region body
PF: predicated region fallthrough
CT: control target
= control target key end

     0   :  { %8 = vsyncpa [#allocation3], 0  ;;  %s777_s0 = inlined_call_operand.hbm [shape: f32[13,32], index: 0, kind: input, shape index: {}]   ;;  %s778_s1 = inlined_call_operand.hbm [shape: f32[32,64], index: 1, kind: input, shape index: {}]   ;;  %s779_s2 = inlined_call_operand.vmem [shape: f32[1,64], index: 2, kind: input, shape index: {}]   ;;  %s780_s3 = inlined_call_operand.vmem [shape: f32[16,128], index: 3, kind: output, shape index: {}]  }
   0x1   :  { %10 = vsyncpa [#allocation3 + $0x1], 0 }
   0x2   :  { %11 = vsyncpa [#allocation5], 0  ;;  %s629_s12 = smov 0   ;;  %s631_s13 = smov 0  }
   0x3   :  { %s633_s14 = smov 0   ;;  %s635_s15 = smov 0  }
   0x4 LB: > { %s648_s16 = sadd.s32 4294967295, %s599_s15   ;;  %p37_p0 = scmp.ne.s32.totalorder %s591_s13, %s587_s12  ;;  %s599_s15 = sphi %s635_s15, %s795_s15   ;;  %s595_s14 = sphi %s633_s14, %s794_s14   ;;  %s591_s13 = sphi %s631_s13, %s793_s13   ;;  %s587_s12 = sphi %s629_s12, %s792_s12  }
   0x5   : > { %p781_p1 = scmp.eq.s32.totalorder %s648_s16, 0  ;;  %p409_p2 = scmp.ge.s32.totalorder %s599_s15, 1 }
   0x6   : > { %p116_p3 = scmp.lt.s32.totalorder %s599_s15, 3  ;;  %s601_s19 = smov [#allocation4]  }
   0x7   : > { %p656_p4 = por %p781_p1, %p37_p0  ;;  %s128_s20 = sshll.u32 %s601_s19, 4  ;;  %s129_s20 = int_to_ptr.vmem [resolvable:$true] %s128_s20 }
   0x8   : > { %p660_p5 = pnand %p409_p2, %p116_p3  ;;  %s673_s22 = sadd.s32 1, %s599_s15  }
   0x9   : > { %s784_s17 = scalar_select %p656_p4, 1, 0 }
   0xa   : > { %s785_s18 = scalar_select %p660_p5, 1, 0 }
   0xb   : > { %p451_p6 = pneg %p660_p5  ;;  %s24_s23 = sadd.s32 1, %s595_s14 }
   0xc   : > { %s21_s24 = ssub.s32 %s599_s15, %s673_s22  ;;  %s503_s27 = scalar_lea.hbm %s778_s1, 512 }
   0xd   : > { %p668_p7 = pnand %p451_p6, %p781_p1  ;;  %p504_p8 = scmp.ne.s32.totalorder %s778_s1, %s503_s27 }
   0xe   : > { %p510_p12 = scmp.lt.u32.totalorder %s503_s27, %s778_s1 }
   0xf   : > { %p505_p9 = pneg %p668_p7 }
  0x11   : > { %p506_p10 = pnand %p505_p9, %p504_p8 }
  0x13   : > { %p507_p11 = pneg %p506_p10 }
  0x15   : > { %p512_p13 = pnand %p510_p12, %p507_p11 }
  0x17   : > { %515 = shalt.err (!%p512_p13)
}
  0x18   : > { %s516_s5 = scalar_lea.vmem %s129_s20, 512  ;;  %p524_p6 = scmp.lt.s32.totalorder %s129_s20, %s129_s20 }
  0x19   : > { %p517_p0 = scmp.ne.s32.totalorder %s129_s20, %s516_s5  ;;  %p525_p1 = scmp.lt.s32.totalorder %s516_s5, %s516_s5 }
  0x1b   : > { %p519_p2 = pnand %p517_p0, %p505_p9  ;;  %p526_p4 = por %p525_p1, %p524_p6 }
  0x1d   : > { %p520_p3 = pneg %p519_p2 }
  0x1f   : > { %p527_p5 = pnand %p526_p4, %p520_p3 }
  0x21   : > { %530 = shalt.err (!%p527_p5)
}
  0x22   : > { %s602_s6 = smov 128   ;;  %s603_s7 = smov 8  }
  0x23   : > { %454 = dma.hbm_to_vmem [thread:$0]  (!%p668_p7), %s778_s1, 512, %s129_s20, [#allocation5], %s602_s6, %s602_s6, %s603_s7  }
  0x24   : > { %p22_p8 = scmp.eq.s32.totalorder %s21_s24, 0  ;;  %p31_p9 = scmp.ne.s32.totalorder %s595_s14, %s591_s13 }
  0x25   : > { %p32_p1 = scmp.eq.s32.totalorder %s599_s15, 0  ;;  %p460_p4 = scmp.lt.s32.totalorder %s599_s15, 2 }
  0x26   : > { %s699_s10 = scalar_select %p22_p8, %s595_s14, %s24_s23  }
  0x27   : > { %p33_p5 = por %p32_p1, %p31_p9  ;;  %s145_s11 = sand.u32 1, %s595_s14  }
  0x28   : > { %s412_s12 = sshll.u32 %s145_s11, 3  ;;  %s413_s19 = sshll.u32 %s599_s15, 7 }
  0x29   : > { %s706_s27 = scalar_lea.hbm %s777_s0, %s413_s19  ;;  %s149_s20 = scalar_lea.vmem [#allocation2], %s412_s12 }
  0x2a   : > { %s156_s21 = sshll.u32 %s149_s20, 4  ;;  %p710_p7 = pnand %p460_p4, %p33_p5  ;;  %s708_s21 = int_to_ptr.vmem [resolvable:$true] %s156_s21 }
  0x2b   : > { %s146_s15 = scalar_lea.sflag [#allocation3], %s145_s11  ;;  %s531_s24 = scalar_lea.hbm %s706_s27, 128 }
  0x2c   : > { %p532_p10 = scmp.ne.s32.totalorder %s706_s27, %s531_s24  ;;  %p533_p11 = pneg %p710_p7 }
  0x2d   : > { %s536_s30 = scalar_lea.hbm %s777_s0, 256  ;;  %p537_p0 = scmp.lt.u32.totalorder %s706_s27, %s777_s0 }
  0x2e   : > { %p534_p12 = pnand %p533_p11, %p532_p10  ;;  %p538_p2 = scmp.lt.u32.totalorder %s536_s30, %s531_s24 }
  0x2f   : > { %p540_p6 = scmp.lt.u32.totalorder %s531_s24, %s706_s27 }
  0x30   : > { %p535_p13 = pneg %p534_p12  ;;  %p539_p3 = por %p538_p2, %p537_p0 }
  0x32   : > { %p541_p8 = por %p540_p6, %p539_p3 }
  0x34   : > { %p542_p9 = pnand %p541_p8, %p535_p13 }
  0x36   : > { %545 = shalt.err (!%p542_p9)
}
  0x37   : > { %s546_s6 = scalar_lea.vmem %s708_s21, 128  ;;  %s604_s7 = smov [#allocation2]  }
  0x38   : > { %p547_p1 = scmp.ne.s32.totalorder %s708_s21, %s546_s6  ;;  %s551_s8 = sshll.u32 %s604_s7, 4  ;;  %s552_s8 = int_to_ptr.vmem [resolvable:$false] %s551_s8 }
  0x39   : > { %s553_s9 = scalar_lea.vmem %s552_s8, 256  ;;  %p554_p10 = scmp.lt.s32.totalorder %s708_s21, %s552_s8 }
  0x3a   : > { %p549_p4 = pnand %p547_p1, %p533_p11  ;;  %p555_p12 = scmp.lt.s32.totalorder %s553_s9, %s546_s6 }
  0x3c   : > { %p550_p5 = pneg %p549_p4  ;;  %p556_p0 = por %p555_p12, %p554_p10 }
  0x3e   : > { %p557_p2 = pnand %p556_p0, %p550_p5 }
  0x40   : > { %560 = shalt.err (!%p557_p2)
}
  0x41   : > { %458 = dma.hbm_to_vmem [thread:$0]  (!%p710_p7), %s706_s27, 128, %s708_s21, %s146_s15  }
  0x42   : > { %p788_p13 = scmp.ne.s32.totalorder %s785_s18, 0 }
  0x43   : > { %s167_s11 = sand.u32 (!%p788_p13), 1, %s591_s13   ;;  %p789_p11 = scmp.ne.s32.totalorder (!%p788_p13), %s784_s17, 0 }
  0x44   : > { %165 = sbr.rel (%p788_p13) target bundleno = 457 (0x1c9), region = 32  ;;  %s415_s12 = sshll.u32 (!%p788_p13), %s167_s11, 3 }
  0x45   : > { %s168_s19 = scalar_lea.sflag (!%p788_p13), [#allocation3], %s167_s11  ;;  %s171_s25 = scalar_lea.vmem (!%p788_p13), [#allocation2], %s415_s12 }
  0x4b   : > { %578 = dma.done.wait (%p789_p11), %s168_s19, 128  }
  0x4c   : > { %580 = vsyncadd (%p789_p11), %s168_s19, 4294967168  ;;  %p790_p3 = scmp.eq.s32.totalorder %s648_s16, 0 }
  0x4e   : > { %582 = dma.done.wait (%p790_p3), [#allocation5], 512   ;;  %p791_p6 = pmov %p790_p3 }
  0x4f   : > { %v605_v0 = vmov 0.0|0.0   ;;  %vm606_vm0 = vmmov 0   ;;  %v607_v1 = vmov 0.0   ;;  %v202_v2 = vld [vmem:[#allocation4] sm:$0xff]  ;;  %v203_v3 = vld [vmem:[#allocation4 + $0x8] sm:$0xff]  ;;  %v204_v4 = vld [vmem:[#allocation4 + $0x10] sm:$0xff]  ;;  %v288_v9 = vlaneseq }
  0x50   : > { %584 = vsyncadd (%p791_p6), [#allocation5], 4294966784  ;;  %439 = vmatprep.subr.bf16.mxu0 %v605_v0  ;;  %436 = vmatprep.mubr.msk.f32.mxu0 %vm606_vm0, %v607_v1  ;;  %v440_v5 = vpack.c.bf16 %v203_v3, %v202_v2  ;;  %v205_v6 = vld [vmem:[#allocation4 + $0x18] sm:$0xff]  ;;  %vm213_vm1 = vcmask 261120   ;;  %s420_s17 = sshll.u32 %s648_s16, 3  ;;  %vm300_vm3 = vcmask 523264  }
  0x51   : > { %v443_v7 = vpack.c.bf16 %v205_v6, %v204_v4  ;;  %v201_v8 = vld [vmem:[%s171_s25] sm:$0xff]  ;;  %s293_s18 = ssub.s32 13, %s420_s17  ;;  %v289_v10 = vshrl.u32 %v288_v9, 7  ;;  %v290_v11 = vstv %s420_s17  ;;  %v418_v13 = vld [vmem:[%s779_s2] ss:$0 sm:$0xff]  ;;  %s608_s21 = smov 64  }
  0x52   : > { %441 = vmatpush3.bf16.msra.mxu0 %v440_v5  ;;  %p294_p7 = scmp.lt.s32.totalorder %s293_s18, 8  ;;  %p197_p8 = scmp.lt.s32.totalorder %s648_s16, 1 }
  0x53   : > { %442 = vmatprep.subr.bf16.mxu0 %v605_v0  ;;  %v291_v12 = vadd.s32 %v290_v11, %v289_v10  ;;  %v329_v38 = vsub.s32 0, %v289_v10  ;;  %vm326_vm4 = vcmp.eq.s32.totalorder %v289_v10, 0 }
  0x54   : > { %s797_s18 = smov (!%p294_p7, %s293_s18), 8  ;;  %s799_s16 = smov (!%p197_p8, %s648_s16), 1 }
  0x55   : > { %s296_s26 = scvt.s32.f32 %s797_s18  ;;  %vm292_vm2 = vcmp.lt.s32.totalorder %v291_v12, 13  ;;  %s417_s23 = sshll.u32 %s799_s16, 3 }
  0x56   : > { %444 = vmatpush3.bf16.msra.mxu0 %v443_v7  ;;  %s200_s28 = scalar_lea.vmem %s780_s3, %s417_s23 }
  0x57   : > { %v308_v16 = vstv %s296_s26 }
  0x58   : > { %501 = vrcp.f32 %v308_v16 }
  0x59   : > { %437 = vmatmul.mubr.msk.f32.vlgmr.msra.gmra.mrb[0].mxu0 %vm213_vm1, %v201_v8 }
  0x62   : > { %v502_v25 = vpop.eup %501 }
 0x12c   : > { %v283_v14 = vpop.f32.mrb[0].mxu0 }
 0x12d   : > { %v284_v15 = vadd.f32 %v418_v13, %v283_v14  ;;  %v438_v17 = vpop.f32.mrb[1].mxu0 }
 0x12f   : > { %v299_v18 = vsel %vm292_vm2, %v284_v15, 0.0 }
 0x130   : > { %v301_v19 = vsel %vm300_vm3, %v299_v18, 0.0 }
 0x131   : > { %v302_v20 = vrot.slane %v301_v19, 4 }
 0x133   : > { %v303_v21 = vadd.f32 %v302_v20, %v301_v19 }
 0x135   : > { %v304_v22 = vrot.slane %v303_v21, 2 }
 0x137   : > { %v305_v23 = vadd.f32 %v304_v22, %v303_v21 }
 0x139   : > { %v306_v24 = vrot.slane %v305_v23, 1 }
 0x13b   : > { %v307_v26 = vadd.f32 %v306_v24, %v305_v23 }
 0x13d   : > { %v310_v27 = vmul.f32 %v502_v25, %v307_v26 }
 0x13f   : > { %v311_v28 = vsub.f32 %v284_v15, %v310_v27 }
 0x141   : > { %v312_v29 = vsel %vm292_vm2, %v311_v28, 0.0 }
 0x142   : > { %v313_v30 = vmul.f32 %v312_v29, %v312_v29 }
 0x144   : > { %v314_v31 = vsel %vm300_vm3, %v313_v30, 0.0 }
 0x145   : > { %v315_v32 = vrot.slane %v314_v31, 4 }
 0x147   : > { %v316_v33 = vadd.f32 %v315_v32, %v314_v31 }
 0x149   : > { %v317_v34 = vrot.slane %v316_v33, 2 }
 0x14b   : > { %v318_v35 = vadd.f32 %v317_v34, %v316_v33 }
 0x14d   : > { %v319_v36 = vrot.slane %v318_v35, 1 }
 0x14f   : > { %v320_v37 = vadd.f32 %v319_v36, %v318_v35 }
 0x151   : > { %322 = vrot.lane.b32.xlu0 %v320_v37, %s608_s21 }
 0x1c3   : > { %v323_v39 = vpop.permute.xlu0 %322 }
 0x1c4   : > { %v325_v40 = vsel %vm300_vm3, %v307_v26, %v323_v39 }
 0x1c5   : > { %v330_v41 = vrot.slane %v325_v40, %v329_v38 }
 0x1c7   : > { %v331_v42 = vsel %vm326_vm4, %v330_v41, 0.0 }
 0x1c8   : > { %332 = vst [vmem:[%s200_s28] sm:$0xff] %v331_v42 }
 0x1c9 PF: > { %p14_p9 = scmp.ge.s32.totalorder %s673_s22, 4   ;;  %s792_s12 = smov %s591_s13 }
 0x1ca   : > { %s793_s13 = smov %s595_s14  ;;  %s794_s14 = smov %s699_s10 }
 0x1cb   : > { %s795_s15 = smov %s673_s22  ;;  %16 = sbr.rel (!%p14_p9) target bundleno = 4 (0x4), region = 76 }
 0x1d2   :  { %352 = vsyncpa [#allocation3], 1 }
 0x1d3   :  { %354 = vsyncpa [#allocation3 + $0x1], 1 }
 0x1d4   :  { %355 = vsyncpa [#allocation5], 1 }

// kernel: encoder_dy_forward.3
= control target key start
LH: loop header
LB: loop body
LE: loop exit
PB: predicated region body
PF: predicated region fallthrough
CT: control target
= control target key end

     0   :  { %s1340_s0 = inlined_call_operand.vmem [shape: f32[13,32], index: 0, kind: input, shape index: {}]   ;;  %s1341_s1 = inlined_call_operand.vmem [shape: bf16[13,64], index: 1, kind: input, shape index: {}]   ;;  %s1342_s2 = inlined_call_operand.vmem [shape: f32[32,64], index: 2, kind: input, shape index: {}]   ;;  %s1343_s3 = inlined_call_operand.vmem [shape: f32[1,64], index: 3, kind: input, shape index: {}]   ;;  %s1344_s4 = inlined_call_operand.vmem [shape: f32[1,64], index: 4, kind: input, shape index: {}]   ;;  %s1345_s5 = inlined_call_operand.vmem [shape: f32[1,64], index: 5, kind: input, shape index: {}]   ;;  %s1346_s6 = inlined_call_operand.vmem [shape: f32[64,128], index: 6, kind: input, shape index: {}]   ;;  %s1347_s7 = inlined_call_operand.vmem [shape: f32[1,128], index: 7, kind: input, shape index: {}]   ;;  %s1348_s8 = inlined_call_operand.hbm [shape: f32[13,64], index: 8, kind: output, shape index: {0}]   ;;  %s1349_s9 = inlined_call_operand.hbm [shape: f32[13,64], index: 9, kind: output, shape index: {1}]   ;;  %s1350_s10 = inlined_call_operand.hbm [shape: f32[13,64], index: 10, kind: output, shape index: {2}]  }
   0x1   :  { %1353 = sst [smem:[#allocation9_spill]] %s1340_s0 }
   0x2   :  { %1354 = sst [smem:[#allocation10_spill]] %s1341_s1 }
   0x3   :  { %1355 = sst [smem:[#allocation11_spill]] %s1342_s2 }
   0x4   :  { %1356 = sst [smem:[#allocation12_spill]] %s1343_s3 }
   0x5   :  { %16 = vsyncpa [#allocation3], 0 }
   0x6   :  { %18 = vsyncpa [#allocation3 + $0x1], 0 }
   0x7   :  { %19 = vsyncpa [#allocation5], 0 }
   0x8   :  { %21 = vsyncpa [#allocation5 + $0x1], 0  ;;  %s1108_s13 = smov 0   ;;  %s1110_s14 = smov 0  }
   0x9   :  { %s1112_s15 = smov 0   ;;  %s1114_s16 = smov 0  }
   0xa LB: > { %s1129_s17 = sadd.s32 4294967295, %s1044_s16   ;;  %s1351_s18 = sadd.s32 4294967294, %s1044_s16   ;;  %s1044_s16 = sphi %s1114_s16, %s1368_s16   ;;  %s1040_s15 = sphi %s1112_s15, %s1367_s15   ;;  %s1036_s14 = sphi %s1110_s14, %s1366_s14   ;;  %s1032_s13 = sphi %s1108_s13, %s1365_s13  }
   0xb   : > { %s1133_s19 = sadd.s32 1, %s1044_s16   ;;  %s212_s20 = sadd.s32 1, %s1040_s15 }
   0xc   : > { %s209_s21 = ssub.s32 %s1044_s16, %s1133_s19  ;;  %p222_p0 = scmp.ne.s32.totalorder %s1040_s15, %s1036_s14 }
   0xd   : > { %p210_p1 = scmp.eq.s32.totalorder %s209_s21, 0  ;;  %p223_p2 = scmp.eq.s32.totalorder %s1129_s17, 1 }
   0xe   : > { %p228_p3 = scmp.ne.s32.totalorder %s1036_s14, %s1032_s13  ;;  %p229_p4 = scmp.eq.s32.totalorder %s1351_s18, 1 }
   0xf   : > { %s1146_s22 = scalar_select %p210_p1, %s1040_s15, %s212_s20  }
  0x10   : > { %p1148_p5 = por %p223_p2, %p222_p0  ;;  %p1152_p6 = por %p229_p4, %p228_p3 }
  0x11   : > { %p785_p7 = scmp.ge.s32.totalorder %s1044_s16, 1  ;;  %p331_p8 = scmp.lt.s32.totalorder %s1044_s16, 3 }
  0x13   : > { %p332_p9 = pnand %p785_p7, %p331_p8 }
  0x14   : > { %s1359_s2 = sld [smem:[#allocation11_spill]] (!%p332_p9)  ;;  %v1046_v3 = vmov (!%p332_p9), 0.0|0.0   ;;  %vm1047_vm0 = vmmov (!%p332_p9), 0   ;;  %v1048_v6 = vmov (!%p332_p9), 0.0   ;;  %p382_p10 = scmp.lt.s32.totalorder (!%p332_p9), %s1129_s17, 1  ;;  %v493_v7 = vld [vmem:[%s1346_s6] sm:$0xff] (!%p332_p9) }
  0x15   : > { %335 = sbr.rel (%p332_p9) target bundleno = 644 (0x284), region = 52  ;;  %849 = vmatprep.subr.bf16.mxu0 (!%p332_p9), %v1046_v3  ;;  %827 = vmatprep.mubr.msk.f32.mxu0 (!%p332_p9), %vm1047_vm0, %v1048_v6  ;;  %v494_v8 = vld [vmem:[%s1346_s6 + $0x8] sm:$0xff] (!%p332_p9)  ;;  %v495_v10 = vld [vmem:[%s1346_s6 + $0x10] sm:$0xff] (!%p332_p9)  ;;  %v496_v11 = vld [vmem:[%s1346_s6 + $0x18] sm:$0xff] (!%p332_p9)  ;;  %s1360_s0 = sld [smem:[#allocation9_spill]] (!%p332_p9)  ;;  %vm402_vm1 = vcmask (!%p332_p9), 261120  }
  0x16   : > { %855 = vmatprep.subr.bf16.mxu1 (!%p332_p9), %v1046_v3  ;;  %v856_v9 = vpack.c.bf16 (!%p332_p9), %v494_v8, %v493_v7  ;;  %846 = vmatprep.mubr.msk.f32.mxu1 (!%p332_p9), %vm1047_vm0, %v1048_v6  ;;  %v859_v13 = vpack.c.bf16 (!%p332_p9), %v496_v11, %v495_v10  ;;  %v497_v15 = vld [vmem:[%s1346_s6 + $0x20] sm:$0xff] (!%p332_p9)  ;;  %v498_v16 = vld [vmem:[%s1346_s6 + $0x28] sm:$0xff] (!%p332_p9)  ;;  %v499_v18 = vld [vmem:[%s1346_s6 + $0x30] sm:$0xff] (!%p332_p9)  ;;  %s1361_s3 = sld [smem:[#allocation12_spill]] (!%p332_p9)  ;;  %vm508_vm2 = vcmask (!%p332_p9), 523264   ;;  %s1352_s20 = sand.u32 (!%p332_p9), 1, %s1036_s14  }
  0x17   : > { %v862_v17 = vpack.c.bf16 (!%p332_p9), %v498_v16, %v497_v15  ;;  %v500_v19 = vld [vmem:[%s1346_s6 + $0x38] sm:$0xff] (!%p332_p9)  ;;  %v793_v23 = vld [vmem:[%s1344_s4] ss:$0 sm:$0xff] (!%p332_p9)  ;;  %s605_s27 = sand.u32 (!%p332_p9), 1, %s1129_s17   ;;  %s1224_s28 = sshll.u32 (!%p332_p9), %s1129_s17, 7 }
  0x18   : > { %857 = vmatpush3.bf16.msra.mxu1 (!%p332_p9), %v856_v9  ;;  %v865_v20 = vpack.c.bf16 (!%p332_p9), %v500_v19, %v499_v18  ;;  %v794_v26 = vld [vmem:[%s1345_s5] ss:$0 sm:$0xff] (!%p332_p9)  ;;  %s1230_s21 = scalar_lea.hbm (!%p332_p9), %s1349_s9, %s1224_s28  ;;  %s1232_s18 = scalar_lea.sflag (!%p332_p9), [#allocation5], %s605_s27 }
  0x19   : > { %858 = vmatprep.subr.bf16.mxu1 (!%p332_p9), %v1046_v3  ;;  %v795_v30 = vld [vmem:[%s1347_s7] ss:$0 sm:$0xff] (!%p332_p9) }
  0x1a   : > { %v391_v0 = vld [vmem:[%s1359_s2] sm:$0xff] (!%p332_p9)  ;;  %v392_v1 = vld [vmem:[%s1359_s2 + $0x8] sm:$0xff] (!%p332_p9)  ;;  %v393_v2 = vld [vmem:[%s1359_s2 + $0x10] sm:$0xff] (!%p332_p9) }
  0x1b   : > { %v850_v4 = vpack.c.bf16 (!%p332_p9), %v392_v1, %v391_v0  ;;  %v394_v5 = vld [vmem:[%s1359_s2 + $0x18] sm:$0xff] (!%p332_p9) }
  0x1c   : > { %v853_v12 = vpack.c.bf16 %v394_v5, %v393_v2  ;;  %s1184_s11 = scalar_select %p382_p10, %s1129_s17, 1  ;;  %860 = vmatpush3.bf16.msra.mxu1 %v859_v13  ;;  %v791_v21 = vld [vmem:[%s1361_s3] ss:$0 sm:$0xff] }
  0x1d   : > { %851 = vmatpush3.bf16.msra.mxu0 %v850_v4  ;;  %861 = vmatprep.subr.bf16.mxu1 %v1046_v3 }
  0x1e   : > { %852 = vmatprep.subr.bf16.mxu0 %v1046_v3  ;;  %s789_s12 = sshll.u32 %s1184_s11, 3 }
  0x1f   : > { %s385_s25 = scalar_lea.vmem %s1360_s0, %s789_s12  ;;  %s1215_s12 = sshll.u32 %s1352_s20, 3 }
  0x20   : > { %v390_v14 = vld [vmem:[%s385_s25] sm:$0xff]  ;;  %863 = vmatpush3.bf16.msra.mxu1 %v862_v17  ;;  %s374_s26 = scalar_lea.vmem [#allocation4], %s1215_s12  ;;  %s1049_s0 = smov [#allocation4]  }
  0x21   : > { %854 = vmatpush3.bf16.msra.mxu0 %v853_v12  ;;  %864 = vmatprep.subr.bf16.mxu1 %v1046_v3  ;;  %s637_s25 = sshll.u32 %s374_s26, 4  ;;  %s926_s2 = sshll.u32 %s1049_s0, 4  ;;  %s638_s25 = int_to_ptr.vmem [resolvable:$true] %s637_s25  ;;  %s927_s2 = int_to_ptr.vmem [resolvable:$false] %s926_s2 }
  0x22   : > { %s922_s20 = scalar_lea.vmem %s638_s25, 128  ;;  %s928_s17 = scalar_lea.vmem %s927_s2, 256 }
  0x23   : > { %p923_p11 = scmp.ne.s32.totalorder %s638_s25, %s922_s20  ;;  %p929_p0 = scmp.lt.s32.totalorder %s638_s25, %s927_s2 }
  0x24   : > { %828 = vmatmul.mubr.msk.f32.vlgmr.msra.gmra.mrb[0].mxu0 %vm402_vm1, %v390_v14  ;;  %866 = vmatpush3.bf16.msra.mxu1 %v865_v20  ;;  %p930_p1 = scmp.lt.s32.totalorder %s928_s17, %s922_s20 }
  0x25   : > { %p924_p12 = pnand %p923_p11, %p1148_p5 }
  0x26   : > { %p931_p2 = por %p930_p1, %p929_p0 }
  0x27   : > { %p925_p13 = pneg %p924_p12 }
  0x29   : > { %p932_p3 = pnand %p931_p2, %p925_p13 }
  0xf7   : > { %v472_v22 = vpop.f32.mrb[0].mxu0 }
  0xf8   : > { %v473_v24 = vadd.f32 %v791_v21, %v472_v22  ;;  %v829_v25 = vpop.f32.mrb[1].mxu0 }
  0xfa   : > { %v483_v27 = vsub.f32 %v473_v24, %v793_v23 }
  0xfc   : > { %v491_v28 = vmul.f32 %v794_v26, %v483_v27 }
  0xfe   : > { %v492_v29 = vmax.f32 %v491_v28, 0.0 }
 0x100   : > { %847 = vmatmul.mubr.msk.f32.vlgmr.msra.gmra.mrb[0].mxu1 %vm508_vm2, %v492_v29 }
 0x1d3   : > { %v578_v31 = vpop.f32.mrb[0].mxu1 }
 0x1d4   : > { %v579_v32 = vadd.f32 %v795_v30, %v578_v31  ;;  %v848_v33 = vpop.f32.mrb[1].mxu1 }
 0x1d6   : > { %v584_v34 = vmul.f32 0.5, %v579_v32  ;;  %594 = vst.msk [vmem:[%s374_s26] sm:$0xff] %vm508_vm2, %v579_v32 }
 0x1d8   : > { %v585_v35 = vmul.f32 1.442695, %v584_v34 }
 0x1da   : > { %920 = vpow2.f32 %v585_v35 }
 0x1db   : > { %935 = shalt.err (!%p932_p3)
}
 0x1dc   : > { %s936_s26 = scalar_lea.hbm %s1230_s21, 128  ;;  %s940_s0 = scalar_lea.hbm %s1349_s9, 256 }
 0x1dd   : > { %p937_p4 = scmp.ne.s32.totalorder %s1230_s21, %s936_s26  ;;  %p941_p9 = scmp.lt.u32.totalorder %s1230_s21, %s1349_s9 }
 0x1de   : > { %p942_p10 = scmp.lt.u32.totalorder %s940_s0, %s936_s26  ;;  %p944_p12 = scmp.lt.u32.totalorder %s936_s26, %s1230_s21 }
 0x1df   : > { %p938_p7 = pnand %p937_p4, %p1148_p5 }
 0x1e0   : > { %p943_p11 = por %p942_p10, %p941_p9 }
 0x1e1   : > { %p939_p8 = pneg %p938_p7 }
 0x1e2   : > { %p945_p13 = por %p944_p12, %p943_p11 }
 0x1e4   : > { %p946_p0 = pnand %p945_p13, %p939_p8 }
 0x1e6   : > { %949 = shalt.err (!%p946_p0)
}
 0x1e7   : > { %868 = dma.vmem_to_hbm [thread:$0]  (%p1148_p5), %s638_s25, 128, %s1230_s21, %s1232_s18   ;;  %v921_v36 = vpop.eup %920 }
 0x1e8   : > { %s1050_s20 = smov 64   ;;  %s790_s17 = sshll.u32 %s1184_s11, 2 }
 0x1e9   : > { %588 = vrot.lane.b32.xlu0 %v921_v36, %s1050_s20  ;;  %s1362_s1 = sld [smem:[#allocation10_spill]]  ;;  %s367_s0 = scalar_lea.vmem [#allocation2], %s1215_s12 }
 0x1ea   : > { %s624_s30 = sshll.u32 %s367_s0, 4  ;;  %s381_s21 = scalar_lea.vmem [#allocation6], %s1215_s12  ;;  %s1264_s30 = int_to_ptr.vmem [resolvable:$true] %s624_s30 }
 0x1eb   : > { %s650_s25 = sshll.u32 %s381_s21, 4  ;;  %s1272_s27 = scalar_lea.hbm %s1350_s10, %s1224_s28  ;;  %s1266_s25 = int_to_ptr.vmem [resolvable:$true] %s650_s25 }
 0x1ec   : > { %s1363_s3 = sand.u32 1, %s1036_s14   ;;  %s950_s26 = scalar_lea.vmem %s1264_s30, 128 }
 0x1ed   : > { %596 = vrot.lane.b32.xlu0 %v579_v32, %s1050_s20  ;;  %s1262_s20 = scalar_lea.hbm %s1348_s8, %s1224_s28  ;;  %s601_s12 = scalar_lea.sflag [#allocation3], %s1363_s3 }
 0x1ee   : > { %p951_p1 = scmp.ne.s32.totalorder %s1264_s30, %s950_s26 }
 0x1ef   : > { %s389_s29 = scalar_lea.vmem %s1362_s1, %s790_s17 }
 0x1f0   : > { %v582_v37 = vld [vmem:[%s389_s29] sm:$0xf]  ;;  %p952_p2 = pnand %p951_p1, %p1148_p5  ;;  %s1051_s29 = smov [#allocation2]  }
 0x1f1   : > { %v583_v38 = vunpack.c.l.bf16 %v582_v37  ;;  %s954_s2 = sshll.u32 %s1051_s29, 4  ;;  %s955_s2 = int_to_ptr.vmem [resolvable:$false] %s954_s2 }
 0x1f2   : > { %p953_p3 = pneg %p952_p2  ;;  %s956_s1 = scalar_lea.vmem %s955_s2, 256 }
 0x1f3   : > { %p957_p4 = scmp.lt.s32.totalorder %s1264_s30, %s955_s2  ;;  %p958_p7 = scmp.lt.s32.totalorder %s956_s1, %s950_s26 }
 0x1f5   : > { %p959_p8 = por %p958_p7, %p957_p4 }
 0x1f7   : > { %p960_p9 = pnand %p959_p8, %p953_p3 }
 0x25b   : > { %v589_v39 = vpop.permute.xlu0 %588 }
 0x25c   : > { %v591_v40 = vmul.f32 %v589_v39, %v583_v38 }
 0x25e   : > { %v592_v41 = vadd.f32 %v591_v40, %v579_v32 }
 0x25f   : > { %v597_v42 = vpop.permute.xlu0 %596 }
 0x260   : > { %599 = vst.msk [vmem:[%s381_s21] sm:$0xff] %vm508_vm2, %v597_v42  ;;  %593 = vst.msk [vmem:[%s367_s0] sm:$0xff] %vm508_vm2, %v592_v41 }
 0x261   : > { %963 = shalt.err (!%p960_p9)
}
 0x262   : > { %s964_s28 = scalar_lea.hbm %s1262_s20, 128  ;;  %s968_s11 = scalar_lea.hbm %s1348_s8, 256 }
 0x263   : > { %p965_p10 = scmp.ne.s32.totalorder %s1262_s20, %s964_s28  ;;  %p969_p13 = scmp.lt.u32.totalorder %s1262_s20, %s1348_s8 }
 0x264   : > { %p970_p0 = scmp.lt.u32.totalorder %s968_s11, %s964_s28  ;;  %p972_p2 = scmp.lt.u32.totalorder %s964_s28, %s1262_s20 }
 0x265   : > { %p966_p11 = pnand %p965_p10, %p1148_p5 }
 0x266   : > { %p971_p1 = por %p970_p0, %p969_p13 }
 0x267   : > { %p967_p12 = pneg %p966_p11 }
 0x268   : > { %p973_p3 = por %p972_p2, %p971_p1 }
 0x26a   : > { %p974_p4 = pnand %p973_p3, %p967_p12 }
 0x26c   : > { %977 = shalt.err (!%p974_p4)
}
 0x26d   : > { %867 = dma.vmem_to_hbm [thread:$0]  (%p1148_p5), %s1264_s30, 128, %s1262_s20, %s601_s12  }
 0x26e   : > { %s978_s1 = scalar_lea.vmem %s1266_s25, 128  ;;  %s1052_s26 = smov [#allocation6]  }
 0x26f   : > { %p979_p7 = scmp.ne.s32.totalorder %s1266_s25, %s978_s1  ;;  %s982_s29 = sshll.u32 %s1052_s26, 4  ;;  %s983_s29 = int_to_ptr.vmem [resolvable:$false] %s982_s29 }
 0x270   : > { %s984_s2 = scalar_lea.vmem %s983_s29, 256  ;;  %p985_p10 = scmp.lt.s32.totalorder %s1266_s25, %s983_s29 }
 0x271   : > { %p980_p8 = pnand %p979_p7, %p1148_p5  ;;  %p986_p11 = scmp.lt.s32.totalorder %s984_s2, %s978_s1 }
 0x273   : > { %p981_p9 = pneg %p980_p8  ;;  %p987_p12 = por %p986_p11, %p985_p10 }
 0x275   : > { %p988_p13 = pnand %p987_p12, %p981_p9 }
 0x277   : > { %991 = shalt.err (!%p988_p13)
}
 0x278   : > { %s992_s30 = scalar_lea.hbm %s1272_s27, 128  ;;  %s996_s28 = scalar_lea.hbm %s1350_s10, 256 }
 0x279   : > { %p993_p0 = scmp.ne.s32.totalorder %s1272_s27, %s992_s30  ;;  %p997_p3 = scmp.lt.u32.totalorder %s1272_s27, %s1350_s10 }
 0x27a   : > { %p998_p4 = scmp.lt.u32.totalorder %s996_s28, %s992_s30  ;;  %p1000_p8 = scmp.lt.u32.totalorder %s992_s30, %s1272_s27 }
 0x27b   : > { %p994_p1 = pnand %p993_p0, %p1148_p5 }
 0x27c   : > { %p999_p7 = por %p998_p4, %p997_p3 }
 0x27d   : > { %p995_p2 = pneg %p994_p1 }
 0x27e   : > { %p1001_p9 = por %p1000_p8, %p999_p7 }
 0x280   : > { %p1002_p10 = pnand %p1001_p9, %p995_p2 }
 0x282   : > { %1005 = shalt.err (!%p1002_p10)
}
 0x283   : > { %869 = dma.vmem_to_hbm [thread:$0]  (%p1148_p5), %s1266_s25, 128, %s1272_s27, %s1232_s18  }
 0x284 PF: > { %p883_p11 = scmp.ge.s32.totalorder %s1044_s16, 2  ;;  %s662_s11 = sand.u32 1, %s1032_s13  }
 0x285   : > { %s663_s17 = scalar_lea.sflag [#allocation3], %s662_s11 }
 0x286   : > { %p874_p12 = pnand %p883_p11, %p1152_p6 }
 0x288   : > { %1023 = dma.done.wait (!%p874_p12), %s663_s17, 128  }
 0x289   : > { %1025 = vsyncadd (!%p874_p12), %s663_s17, 4294967168  ;;  %s1364_s3 = sadd.s32 4294967294, %s1044_s16  }
 0x28a   : > { %s671_s1 = sand.u32 1, %s1364_s3  }
 0x28b   : > { %s672_s26 = scalar_lea.sflag [#allocation5], %s671_s1 }
 0x28c   : > { %1027 = dma.done.wait (!%p874_p12), %s672_s26, 256  }
 0x28d   : > { %1029 = vsyncadd (!%p874_p12), %s672_s26, 4294967040  ;;  %p24_p5 = scmp.ge.s32.totalorder %s1133_s19, 4   ;;  %s1365_s13 = smov %s1036_s14 }
 0x28e   : > { %s1366_s14 = smov %s1040_s15  ;;  %s1367_s15 = smov %s1146_s22 }
 0x28f   : > { %s1368_s16 = smov %s1133_s19  ;;  %26 = sbr.rel (!%p24_p5) target bundleno = 10 (0xa), region = 122 }
 0x296   :  { %686 = vsyncpa [#allocation3], 1 }
 0x297   :  { %688 = vsyncpa [#allocation3 + $0x1], 1 }
 0x298   :  { %689 = vsyncpa [#allocation5], 1 }
 0x299   :  { %691 = vsyncpa [#allocation5 + $0x1], 1 }

</bundles_post_ra>
